<compile_context>
chip_gen: v7x
topology: tpu7x:2x2x1
jax: 0.10.0
libtpu: 0.0.40
codegen_flags: <defaults>
</compile_context>

<pallas_src>
import functools

import jax
import jax.numpy as jnp
from jax import lax
from jax.experimental import pallas as pl
from jax.experimental.pallas import tpu as pltpu

LANE = 128


def _round_up(v, m):
    return (v + m - 1) // m * m


def _pad2d(a, rows, cols):
    r, c = a.shape
    return jnp.pad(a, ((0, rows - r), (0, cols - c)))


# ------------------------------ fused SAGEConv layer kernel ------------------------------
# layer 1: out = relu([A_rows @ X, X_rows] @ [W1l;W1r] + b1)               (bf16 out)
# layer 2: out = log_softmax([A_rows @ H, H_rows] @ [W2l;W2r] + b2, -1)    (f32  out)
def _sage_conv_kernel(a_ref, xfull_ref, w_ref, b_ref, out_ref, *,
                      block_rows, log_softmax, num_classes):
    # a_ref:     (TM, Np)     bf16   adjacency row tile (streamed)
    # xfull_ref: (Np, Kp)     bf16   full node-feature matrix (resident)
    # w_ref:     (2*Kp, Mp)   bf16   fused [W_l ; W_r]
    # b_ref:     (1, Mp)      f32    bias (lin_l)
    # out_ref:   (TM, Mp)
    row0 = pl.multiple_of(pl.program_id(0) * block_rows, LANE)
    x_rows = xfull_ref[pl.ds(row0, block_rows), :]            # root-term rows (bf16)

    agg = jnp.dot(a_ref[...], xfull_ref[...],
                  preferred_element_type=jnp.float32)          # mean aggregation
    z = jnp.concatenate([agg.astype(jnp.bfloat16), x_rows], axis=-1)
    y = jnp.dot(z, w_ref[...], preferred_element_type=jnp.float32) + b_ref[...]

    if not log_softmax:
        # SAGEConv1 -> ReLU -> dropout (eval mode: identity, see TODO at top)
        out_ref[...] = jnp.maximum(y, 0.0).astype(out_ref.dtype)
    else:
        # mask padded class lanes so they do not inflate the LSE
        col = lax.broadcasted_iota(jnp.int32, y.shape, 1)
        y = jnp.where(col < num_classes, y, -1e30)
        m = jnp.max(y, axis=1, keepdims=True)
        s = y - m
        lse = jnp.log(jnp.sum(jnp.exp(s), axis=1, keepdims=True))
        out_ref[...] = (s - lse).astype(out_ref.dtype)


def _vmem_capacity_bytes():
    try:
        return int(pltpu.get_tpu_info().vmem_capacity_bytes)
    except Exception:
        return 64 * 1024 * 1024  # conservative (v7x per-TC)


def _pick_row_tile(n_pad, k_pad, m_pad, out_bytes, vmem_cap):
    """Largest 128-multiple row tile whose footprint fits comfortably in VMEM."""
    budget = int(vmem_cap * 3 // 4)
    resident = 2 * (n_pad * k_pad * 2            # full feature matrix (bf16)
                    + 2 * k_pad * m_pad * 2      # fused weights (bf16)
                    + m_pad * 4)                 # bias (f32)
    per_row = 2 * (n_pad * 2 + m_pad * out_bytes)  # adjacency + output tiles (dbl-buffered)
    tm = (budget - resident - (16 << 20)) // per_row
    tm = max(LANE, (tm // LANE) * LANE)
    return min(tm, n_pad)


def _vmem_estimate(tm, n_pad, k_pad, m_pad, out_bytes):
    est = (2 * tm * n_pad * 2           # adjacency tile, double-buffered (bf16)
           + 2 * n_pad * k_pad * 2      # full feature matrix (bf16)
           + 2 * 2 * k_pad * m_pad * 2  # fused weights (bf16)
           + 2 * m_pad * 4              # bias (f32)
           + 2 * tm * m_pad * out_bytes # output tile, double-buffered
           + tm * k_pad * (4 + 2 * 2))  # in-kernel temporaries (agg f32, z bf16)
    return est + (24 << 20)             # headroom for compiler scratch


def _sage_layer(a_bf, feats, w_fused, b_f32, *, out_dtype, log_softmax, num_classes,
                vmem_cap):
    n_pad = a_bf.shape[0]
    k_pad = feats.shape[1]
    m_pad = w_fused.shape[1]
    out_bytes = jnp.dtype(out_dtype).itemsize

    tm = _pick_row_tile(n_pad, k_pad, m_pad, out_bytes, vmem_cap)
    grid = (n_pad // tm,)
    vmem = min(vmem_cap, _vmem_estimate(tm, n_pad, k_pad, m_pad, out_bytes))

    kernel = functools.partial(_sage_conv_kernel, block_rows=tm,
                               log_softmax=log_softmax, num_classes=num_classes)
    return pl.pallas_call(
        kernel,
        out_shape=jax.ShapeDtypeStruct((n_pad, m_pad), out_dtype),
        grid=grid,
        in_specs=[
            pl.BlockSpec((tm, n_pad), lambda i: (i, 0)),        # adjacency row tile
            pl.BlockSpec((n_pad, k_pad), lambda i: (0, 0)),     # full features (resident)
            pl.BlockSpec((2 * k_pad, m_pad), lambda i: (0, 0)), # fused weights
            pl.BlockSpec((1, m_pad), lambda i: (0, 0)),         # bias
        ],
        out_specs=pl.BlockSpec((tm, m_pad), lambda i: (i, 0)),
        compiler_params=pltpu.CompilerParams(
            dimension_semantics=("parallel",),
            vmem_limit_bytes=int(vmem)),
    )(a_bf, feats, w_fused, b_f32)


def graphsage_net(adj_mean, x, params):
    (w1l, w1r, b1, w2l, w2r, b2) = params
    n, f = x.shape
    h_dim = w1l.shape[1]
    c = w2l.shape[1]

    n_pad = _round_up(n, LANE)
    f_pad = _round_up(f, LANE)
    h_pad = _round_up(h_dim, LANE)
    c_pad = _round_up(c, LANE)

    # pad to lane-dense shapes, cast MXU operands to bf16 (biases stay f32)
    a_bf = _pad2d(adj_mean, n_pad, n_pad).astype(jnp.bfloat16)
    x_bf = _pad2d(x, n_pad, f_pad).astype(jnp.bfloat16)
    w1 = jnp.concatenate([_pad2d(w1l, f_pad, h_pad),
                          _pad2d(w1r, f_pad, h_pad)], axis=0).astype(jnp.bfloat16)
    w2 = jnp.concatenate([_pad2d(w2l, h_pad, c_pad),
                          _pad2d(w2r, h_pad, c_pad)], axis=0).astype(jnp.bfloat16)
    b1p = _pad2d(b1, 1, h_pad).astype(jnp.float32)
    b2p = _pad2d(b2, 1, c_pad).astype(jnp.float32)

    vmem_cap = _vmem_capacity_bytes()

    # ---- layer 1: h = relu(SAGEConv1(x)) ----
    h = _sage_layer(a_bf, x_bf, w1, b1p, out_dtype=jnp.bfloat16,
                    log_softmax=False, num_classes=0, vmem_cap=vmem_cap)

    # ---- layer 2: log_softmax(SAGEConv2(h)) ----
    out = _sage_layer(a_bf, h, w2, b2p, out_dtype=jnp.float32,
                      log_softmax=True, num_classes=c, vmem_cap=vmem_cap)

    return out[:n, :c]


def build_mean_adj(edge_index, num_nodes):
    """Dense mean-aggregation matrix from a (2, E) edge_index (src row 0, dst row 1)."""
    src, dst = edge_index[0], edge_index[1]
    a = jnp.zeros((num_nodes, num_nodes), jnp.float32)
    a = a.at[dst, src].add(1.0)
    deg = jnp.sum(a, axis=1, keepdims=True)
    return a / jnp.maximum(deg, 1.0)


def _reference(adj_mean, x, params):
    """Pure-JAX f32 reference of the same forward pass (eval-mode dropout)."""
    (w1l, w1r, b1, w2l, w2r, b2) = params
    h = (adj_mean @ x) @ w1l + b1 + x @ w1r
    h = jnp.maximum(h, 0.0)
    logits = (adj_mean @ h) @ w2l + b2 + h @ w2r
    return jax.nn.log_softmax(logits, axis=1)


if __name__ == "__main__":
    key = jax.random.PRNGKey(0)

    # Small synthetic "Cora-like" graph.
    N = 128        # nodes
    F = 16         # input features
    H = 32         # hidden
    C = 8          # classes
    E = 512        # edges

    k_x, k_e_src, k_e_dst, k1, k2, k3, k4, k5, k6 = jax.random.split(key, 9)

    x = jax.random.normal(k_x, (N, F), jnp.float32)
    edge_index = jnp.stack([
        jax.random.randint(k_e_src, (E,), 0, N),
        jax.random.randint(k_e_dst, (E,), 0, N),
    ], axis=0)
    adj_mean = build_mean_adj(edge_index, N)

    # Deterministic parameter init (SAGEConv: lin_l has bias, lin_r has no bias).
    def init(k, shape, fan_in):
        bound = 1.0 / jnp.sqrt(jnp.float32(fan_in))
        return jax.random.uniform(k, shape, jnp.float32, -bound, bound)

    w1l = init(k1, (F, H), F)
    w1r = init(k2, (F, H), F)
    b1 = init(k3, (1, H), F)
    w2l = init(k4, (H, C), H)
    w2r = init(k5, (H, C), H)
    b2 = init(k6, (1, C), H)
    params = (w1l, w1r, b1, w2l, w2r, b2)

    out = graphsage_net(adj_mean, x, params)
    out = jax.block_until_ready(out)

    # Sanity: shape, finiteness, rows sum to ~1 in prob space, matches f32 reference
    # (loose tolerance: kernel MXU operands are bf16).
    ref = _reference(adj_mean, x, params)
    row_sums = jnp.sum(jnp.exp(out), axis=1)
    assert out.shape == (N, C)
    assert bool(jnp.all(jnp.isfinite(out)))
    assert bool(jnp.all(jnp.abs(row_sums - 1.0) < 1e-3))
    assert bool(jnp.max(jnp.abs(out - ref)) < 0.2)

    print("KERNEL_OK")
</pallas_src>

<mosaic_0001>
module attributes {stable_mosaic.version = 11 : i64} {
  func.func @_sage_conv_kernel(%arg0: i32, %arg1: memref<128x128xbf16, #tpu.memory_space<vmem>>, %arg2: memref<128x128xbf16, #tpu.memory_space<vmem>>, %arg3: memref<256x128xbf16, #tpu.memory_space<vmem>>, %arg4: memref<1x128xf32, #tpu.memory_space<vmem>>, %arg5: memref<128x128xbf16, #tpu.memory_space<vmem>>) attributes {dimension_semantics = [#tpu.dimension_semantics<parallel>], iteration_bounds = array<i64: 1>, scalar_prefetch = 0 : i64, scratch_operands = 0 : i64, tpu.core_type = #tpu.core_type<tc>, window_params = [{transform_indices = @transform_0, window_bounds = array<i64: 128, 128>}, {pipeline_mode = #tpu.pipeline_mode<synchronous>, transform_indices = @transform_1, window_bounds = array<i64: 128, 128>}, {pipeline_mode = #tpu.pipeline_mode<synchronous>, transform_indices = @transform_2, window_bounds = array<i64: 256, 128>}, {pipeline_mode = #tpu.pipeline_mode<synchronous>, transform_indices = @transform_3, window_bounds = array<i64: 1, 128>}, {transform_indices = @transform_4, window_bounds = array<i64: 128, 128>}]} {
    %c128_i32 = arith.constant 128 : i32
    %0 = arith.muli %arg0, %c128_i32 : i32
    %1 = tpu.assume_multiple %0, 128 : i32
    %2 = arith.index_cast %1 : i32 to index
    %c0 = arith.constant 0 : index
    %3 = vector.load %arg2[%2, %c0] : memref<128x128xbf16, #tpu.memory_space<vmem>>, vector<128x128xbf16>
    %c0_0 = arith.constant 0 : index
    %c0_1 = arith.constant 0 : index
    %4 = vector.load %arg1[%c0_0, %c0_1] : memref<128x128xbf16, #tpu.memory_space<vmem>>, vector<128x128xbf16>
    %c0_2 = arith.constant 0 : index
    %c0_3 = arith.constant 0 : index
    %5 = vector.load %arg2[%c0_2, %c0_3] : memref<128x128xbf16, #tpu.memory_space<vmem>>, vector<128x128xbf16>
    %cst = arith.constant dense<0.000000e+00> : vector<128x128xf32>
    %6 = tpu.matmul %4, %5, %cst {dimension_numbers = #tpu.dot_dimension_numbers<[1], [0], [0], [1], [0, 0, 1, 1], [], []>} : vector<128x128xbf16>, vector<128x128xbf16>, vector<128x128xf32> -> vector<128x128xf32>
    %7 = arith.truncf %6 : vector<128x128xf32> to vector<128x128xbf16>
    %8 = tpu.concatenate %7, %3 in 1 : vector<128x128xbf16>, vector<128x128xbf16> -> vector<128x256xbf16>
    %c0_4 = arith.constant 0 : index
    %c0_5 = arith.constant 0 : index
    %9 = vector.load %arg3[%c0_4, %c0_5] : memref<256x128xbf16, #tpu.memory_space<vmem>>, vector<256x128xbf16>
    %cst_6 = arith.constant dense<0.000000e+00> : vector<128x128xf32>
    %10 = tpu.matmul %8, %9, %cst_6 {dimension_numbers = #tpu.dot_dimension_numbers<[1], [0], [0], [1], [0, 0, 1, 1], [], []>} : vector<128x256xbf16>, vector<256x128xbf16>, vector<128x128xf32> -> vector<128x128xf32>
    %c0_7 = arith.constant 0 : index
    %c0_8 = arith.constant 0 : index
    %11 = vector.load %arg4[%c0_7, %c0_8] : memref<1x128xf32, #tpu.memory_space<vmem>>, vector<1x128xf32>
    %12 = vector.broadcast %11 : vector<1x128xf32> to vector<128x128xf32>
    %13 = arith.addf %10, %12 : vector<128x128xf32>
    %cst_9 = arith.constant 0.000000e+00 : f32
    %14 = vector.broadcast %cst_9 : f32 to vector<128x128xf32>
    %15 = arith.maximumf %13, %14 : vector<128x128xf32>
    %16 = arith.truncf %15 : vector<128x128xf32> to vector<128x128xbf16>
    %c0_10 = arith.constant 0 : index
    %c0_11 = arith.constant 0 : index
    %17 = vector.load %arg5[%c0_10, %c0_11] : memref<128x128xbf16, #tpu.memory_space<vmem>>, vector<128x128xbf16>
    tpu.vector_store %arg5[%c0_10, %c0_11], %16 {strides = array<i32>} : memref<128x128xbf16, #tpu.memory_space<vmem>>, vector<128x128xbf16>,
    return
  }
  func.func @transform_0(%arg0: i32) -> (i32, i32) {
    %c0_i32 = arith.constant 0 : i32
    %c0_i32_0 = arith.constant 0 : i32
    return %arg0, %c0_i32 : i32, i32
  }
  func.func @transform_1(%arg0: i32) -> (i32, i32) {
    %c0_i32 = arith.constant 0 : i32
    %c0_i32_0 = arith.constant 0 : i32
    %c0_i32_1 = arith.constant 0 : i32
    return %c0_i32, %c0_i32_0 : i32, i32
  }
  func.func @transform_2(%arg0: i32) -> (i32, i32) {
    %c0_i32 = arith.constant 0 : i32
    %c0_i32_0 = arith.constant 0 : i32
    %c0_i32_1 = arith.constant 0 : i32
    return %c0_i32, %c0_i32_0 : i32, i32
  }
  func.func @transform_3(%arg0: i32) -> (i32, i32) {
    %c0_i32 = arith.constant 0 : i32
    %c0_i32_0 = arith.constant 0 : i32
    %c0_i32_1 = arith.constant 0 : i32
    return %c0_i32, %c0_i32_0 : i32, i32
  }
  func.func @transform_4(%arg0: i32) -> (i32, i32) {
    %c0_i32 = arith.constant 0 : i32
    %c0_i32_0 = arith.constant 0 : i32
    return %arg0, %c0_i32 : i32, i32
  }
}

</mosaic_0001>

<bundles_post_ra>
// kernel: tpu_custom_call.1
= control target key start
LH: loop header
LB: loop body
LE: loop exit
PB: predicated region body
PF: predicated region fallthrough
CT: control target
= control target key end

     0   :  { %9 = vsyncpa [#allocation3], 0  ;;  %s1217_s0 = inlined_call_operand.hbm [shape: bf16[128,128], index: 0, kind: input, shape index: {}]   ;;  %s1218_s1 = inlined_call_operand.hbm [shape: bf16[128,128], index: 1, kind: input, shape index: {}]   ;;  %s1219_s2 = inlined_call_operand.hbm [shape: bf16[256,128], index: 2, kind: input, shape index: {}]   ;;  %s1220_s3 = inlined_call_operand.vmem [shape: f32[1,128], index: 3, kind: input, shape index: {}]   ;;  %s1221_s4 = inlined_call_operand.hbm [shape: bf16[128,128], index: 4, kind: output, shape index: {}]  }
   0x1   :  { %10 = vsyncpa [#allocation6], 0 }
   0x2   :  { %11 = vsyncpa [#allocation4], 0  ;;  %s1098_s15 = smov [#allocation5]   ;;  %s1099_s17 = smov [#allocation2]  }
   0x3   :  { %s29_s16 = sshll.u32 %s1098_s15, 4  ;;  %s17_s18 = sshll.u32 %s1099_s17, 4  ;;  %s30_s16 = int_to_ptr.vmem [resolvable:$true] %s29_s16  ;;  %s1129_s18 = int_to_ptr.vmem [resolvable:$true] %s17_s18 }
   0x4   :  { %s1004_s21 = scalar_lea.hbm %s1218_s1, 1024 }
   0x5   :  { %p1005_p0 = scmp.ne.s32.totalorder %s1218_s1, %s1004_s21  ;;  %p1008_p1 = scmp.lt.u32.totalorder %s1004_s21, %s1218_s1 }
   0x7   :  { %p1010_p2 = pnand %p1008_p1, %p1005_p0 }
   0x9   :  { %1013 = shalt.err (!%p1010_p2)
}
   0xa   :  { %s1014_s26 = scalar_lea.vmem %s30_s16, 1024  ;;  %p1019_p4 = scmp.lt.s32.totalorder %s30_s16, %s30_s16 }
   0xb   :  { %p1015_p3 = scmp.ne.s32.totalorder %s30_s16, %s1014_s26  ;;  %p1020_p5 = scmp.lt.s32.totalorder %s1014_s26, %s1014_s26 }
   0xd   :  { %p1021_p6 = por %p1020_p5, %p1019_p4 }
   0xf   :  { %p1022_p7 = pnand %p1021_p6, %p1015_p3 }
  0x11   :  { %1025 = shalt.err (!%p1022_p7)
}
  0x12   :  { %s1100_s27 = smov 64   ;;  %s1101_s28 = smov 4  }
  0x13   :  { %35 = dma.hbm_to_vmem [thread:$0]  %s1218_s1, 1024, %s30_s16, [#allocation6], %s1100_s27, %s1100_s27, %s1101_s28  }
  0x14   :  { %s1026_s7 = scalar_lea.hbm %s1217_s0, 1024 }
  0x15   :  { %p1027_p8 = scmp.ne.s32.totalorder %s1217_s0, %s1026_s7  ;;  %p1030_p9 = scmp.lt.u32.totalorder %s1026_s7, %s1217_s0 }
  0x17   :  { %p1032_p10 = pnand %p1030_p9, %p1027_p8 }
  0x19   :  { %1035 = shalt.err (!%p1032_p10)
}
  0x1a   :  { %s1036_s12 = scalar_lea.vmem %s1129_s18, 1024  ;;  %p1041_p12 = scmp.lt.s32.totalorder %s1129_s18, %s1129_s18 }
  0x1b   :  { %p1037_p11 = scmp.ne.s32.totalorder %s1129_s18, %s1036_s12  ;;  %p1042_p13 = scmp.lt.s32.totalorder %s1036_s12, %s1036_s12 }
  0x1d   :  { %p1043_p0 = por %p1042_p13, %p1041_p12 }
  0x1f   :  { %p1044_p1 = pnand %p1043_p0, %p1037_p11 }
  0x21   :  { %1047 = shalt.err (!%p1044_p1)
}
  0x22   :  { %23 = dma.hbm_to_vmem [thread:$0]  %s1217_s0, 1024, %s1129_s18, [#allocation3], %s1100_s27, %s1100_s27, %s1101_s28  }
  0x23   :  { %s1102_s14 = smov [#allocation7]   ;;  %s1048_s19 = scalar_lea.hbm %s1219_s2, 2048 }
  0x24   :  { %s41_s15 = sshll.u32 %s1102_s14, 4  ;;  %p1049_p2 = scmp.ne.s32.totalorder %s1219_s2, %s1048_s19  ;;  %s42_s15 = int_to_ptr.vmem [resolvable:$true] %s41_s15 }
  0x25   :  { %p1052_p3 = scmp.lt.u32.totalorder %s1048_s19, %s1219_s2 }
  0x27   :  { %p1054_p4 = pnand %p1052_p3, %p1049_p2 }
  0x29   :  { %1057 = shalt.err (!%p1054_p4)
}
  0x2a   :  { %s1058_s24 = scalar_lea.vmem %s42_s15, 2048  ;;  %p1063_p6 = scmp.lt.s32.totalorder %s42_s15, %s42_s15 }
  0x2b   :  { %p1059_p5 = scmp.ne.s32.totalorder %s42_s15, %s1058_s24  ;;  %p1064_p7 = scmp.lt.s32.totalorder %s1058_s24, %s1058_s24 }
  0x2d   :  { %p1065_p8 = por %p1064_p7, %p1063_p6 }
  0x2f   :  { %p1066_p9 = pnand %p1065_p8, %p1059_p5 }
  0x31   :  { %1069 = shalt.err (!%p1066_p9)
}
  0x32   :  { %47 = dma.hbm_to_vmem [thread:$0]  %s1219_s2, 2048, %s42_s15, [#allocation6], %s1100_s27, %s1100_s27, %s1101_s28  }
  0x33   :  { %1092 = dma.done.wait [#allocation3], 1024  }
  0x34   :  { %1093 = vsyncadd [#allocation3], 4294966272 }
  0x35   :  { %1094 = dma.done.wait [#allocation6], 3072  }
  0x36   :  { %1095 = vsyncadd [#allocation6], 4294964224  ;;  %v964_v0 = vld [vmem:[#allocation5] sm:$0xff]   ;;  %v965_v1 = vld [vmem:[#allocation5 + $0x8] sm:$0xff]  }
  0x37   :  { %910 = vmatprep.subr.bf16.mxu0 %v964_v0  ;;  %v966_v2 = vld [vmem:[#allocation5 + $0x10] sm:$0xff]   ;;  %v967_v3 = vld [vmem:[#allocation5 + $0x18] sm:$0xff]   ;;  %v972_v4 = vld [vmem:[#allocation2] sm:$0xff]  }
  0x38   :  { %911 = vmatpush3.bf16.msra.mxu0 %v964_v0  ;;  %926 = vmatprep.mubr.bf16.mxu0 %v972_v4  ;;  %v968_v5 = vld [vmem:[#allocation5 + $0x20] sm:$0xff]   ;;  %v969_v6 = vld [vmem:[#allocation5 + $0x28] sm:$0xff]   ;;  %v970_v10 = vld [vmem:[#allocation5 + $0x30] sm:$0xff]  }
  0x39   :  { %912 = vmatprep.subr.bf16.mxu0 %v965_v1  ;;  %v980_v7 = vld [vmem:[#allocation7 + $0x40] sm:$0xff]   ;;  %v982_v9 = vld [vmem:[#allocation7 + $0x48] sm:$0xff]   ;;  %v984_v12 = vld [vmem:[#allocation7 + $0x50] sm:$0xff]  }
  0x3a   :  { %v981_v8 = vld [vmem:[#allocation7] sm:$0xff]   ;;  %942 = vmatprep.subr.bf16.mxu1 %v980_v7  ;;  %v983_v11 = vld [vmem:[#allocation7 + $0x8] sm:$0xff]   ;;  %v971_v13 = vld [vmem:[#allocation5 + $0x38] sm:$0xff]  }
  0x3b   :  { %950 = vmatpush3.bf16.msra.mxu1 %v981_v8  ;;  %v985_v14 = vld [vmem:[#allocation7 + $0x10] sm:$0xff]   ;;  %v986_v15 = vld [vmem:[#allocation7 + $0x58] sm:$0xff]   ;;  %v973_v16 = vld [vmem:[#allocation2 + $0x8] sm:$0xff]  }
  0x3c   :  { %913 = vmatpush3.bf16.msra.mxu0 %v965_v1  ;;  %943 = vmatprep.subr.bf16.mxu1 %v982_v9  ;;  %v987_v17 = vld [vmem:[#allocation7 + $0x18] sm:$0xff]   ;;  %v974_v18 = vld [vmem:[#allocation2 + $0x10] sm:$0xff]   ;;  %v988_v19 = vld [vmem:[#allocation7 + $0x60] sm:$0xff]  }
  0x3d   :  { %914 = vmatprep.subr.bf16.mxu0 %v966_v2  ;;  %v989_v20 = vld [vmem:[#allocation7 + $0x20] sm:$0xff]   ;;  %v990_v21 = vld [vmem:[#allocation7 + $0x68] sm:$0xff]   ;;  %v975_v22 = vld [vmem:[#allocation2 + $0x18] sm:$0xff]  }
  0x3e   :  { %v991_v23 = vld [vmem:[#allocation7 + $0x28] sm:$0xff]   ;;  %v976_v24 = vld [vmem:[#allocation2 + $0x20] sm:$0xff]   ;;  %v992_v25 = vld [vmem:[#allocation7 + $0x70] sm:$0xff]  }
  0x3f   :  { %951 = vmatpush3.bf16.msra.mxu1 %v983_v11  ;;  %v993_v26 = vld [vmem:[#allocation7 + $0x30] sm:$0xff]   ;;  %v977_v27 = vld [vmem:[#allocation2 + $0x28] sm:$0xff]   ;;  %v979_v29 = vld [vmem:[#allocation2 + $0x38] sm:$0xff]  }
  0x40   :  { %915 = vmatpush3.bf16.msra.mxu0 %v966_v2  ;;  %944 = vmatprep.subr.bf16.mxu1 %v984_v12  ;;  %v978_v28 = vld [vmem:[#allocation2 + $0x30] sm:$0xff]   ;;  %v994_v30 = vld [vmem:[#allocation7 + $0x78] sm:$0xff]   ;;  %v996_v32 = vld [vmem:[#allocation5] sm:$0xff]  }
  0x41   :  { %916 = vmatprep.subr.bf16.mxu0 %v967_v3  ;;  %v995_v31 = vld [vmem:[#allocation7 + $0x38] sm:$0xff]   ;;  %v998_v33 = vld [vmem:[#allocation5 + $0x10] sm:$0xff]   ;;  %v997_v39 = vld [vmem:[#allocation5 + $0x8] sm:$0xff]  }
  0x42   :  { %545 = vmatprep.mubr.bf16.mxu1 %v998_v33  ;;  %v999_v46 = vld [vmem:[#allocation5 + $0x18] sm:$0xff]   ;;  %v1000_v53 = vld [vmem:[#allocation5 + $0x20] sm:$0xff]   ;;  %v1001_v58 = vld [vmem:[#allocation5 + $0x28] sm:$0xff]  }
  0x43   :  { %952 = vmatpush3.bf16.msra.mxu1 %v985_v14  ;;  %v1002_v62 = vld [vmem:[#allocation5 + $0x30] sm:$0xff]   ;;  %v1003_v63 = vld [vmem:[#allocation5 + $0x38] sm:$0xff]   ;;  %v1184_v1 = vld [vmem:[%s1220_s3] ss:$0 sm:$0xff]  ;;  %s1103_s3 = smov [#allocation8]  }
  0x44   :  { %917 = vmatpush3.bf16.msra.mxu0 %v967_v3  ;;  %945 = vmatprep.subr.bf16.mxu1 %v986_v15  ;;  %s695_s26 = sshll.u32 %s1103_s3, 4  ;;  %s696_s26 = int_to_ptr.vmem [resolvable:$true] %s695_s26 }
  0x45   :  { %918 = vmatprep.subr.bf16.mxu0 %v968_v5  ;;  %s1070_s29 = scalar_lea.vmem %s696_s26, 1024  ;;  %p1075_p11 = scmp.lt.s32.totalorder %s696_s26, %s696_s26 }
  0x46   :  { %p1071_p10 = scmp.ne.s32.totalorder %s696_s26, %s1070_s29  ;;  %p1076_p12 = scmp.lt.s32.totalorder %s1070_s29, %s1070_s29 }
  0x47   :  { %953 = vmatpush3.bf16.msra.mxu1 %v987_v17 }
  0x48   :  { %919 = vmatpush3.bf16.msra.mxu0 %v968_v5  ;;  %946 = vmatprep.subr.bf16.mxu1 %v988_v19  ;;  %p1077_p13 = por %p1076_p12, %p1075_p11 }
  0x49   :  { %920 = vmatprep.subr.bf16.mxu0 %v969_v6 }
  0x4a   :  { %p1078_p0 = pnand %p1077_p13, %p1071_p10 }
  0x4b   :  { %954 = vmatpush3.bf16.msra.mxu1 %v989_v20 }
  0x4c   :  { %921 = vmatpush3.bf16.msra.mxu0 %v969_v6  ;;  %947 = vmatprep.subr.bf16.mxu1 %v990_v21 }
  0x4d   :  { %922 = vmatprep.subr.bf16.mxu0 %v970_v10 }
  0x4f   :  { %955 = vmatpush3.bf16.msra.mxu1 %v991_v23 }
  0x50   :  { %923 = vmatpush3.bf16.msra.mxu0 %v970_v10  ;;  %948 = vmatprep.subr.bf16.mxu1 %v992_v25 }
  0x51   :  { %924 = vmatprep.subr.bf16.mxu0 %v971_v13 }
  0x53   :  { %956 = vmatpush3.bf16.msra.mxu1 %v993_v26 }
  0x54   :  { %925 = vmatpush3.bf16.msra.mxu0 %v971_v13  ;;  %949 = vmatprep.subr.bf16.mxu1 %v994_v30 }
  0x55   :  { %846 = vmatprep.subr.bf16.mxu0 %v980_v7 }
  0x57   :  { %927 = vmatmul.mubr.bf16.vlgmr.msra.gmra.mrb[0].mxu0 %v973_v16  ;;  %957 = vmatpush3.bf16.msra.mxu1 %v995_v31 }
  0x58   :  { %930 = vmatprep.mubr.bf16.mxu0 %v974_v18  ;;  %847 = vmatpush3.bf16.msra.mxu0 %v981_v8 }
  0x59   :  { %848 = vmatprep.subr.bf16.mxu0 %v982_v9 }
  0x5c   :  { %849 = vmatpush3.bf16.msra.mxu0 %v983_v11 }
  0x5d   :  { %850 = vmatprep.subr.bf16.mxu0 %v984_v12 }
  0x5f   :  { %931 = vmatmul.mubr.bf16.gmra.mrb[4].mxu0 %v975_v22 }
  0x60   :  { %934 = vmatprep.mubr.bf16.mxu0 %v976_v24  ;;  %851 = vmatpush3.bf16.msra.mxu0 %v985_v14 }
  0x61   :  { %852 = vmatprep.subr.bf16.mxu0 %v986_v15 }
  0x64   :  { %853 = vmatpush3.bf16.msra.mxu0 %v987_v17 }
  0x65   :  { %854 = vmatprep.subr.bf16.mxu0 %v988_v19 }
  0x67   :  { %935 = vmatmul.mubr.bf16.gmra.mrb[8].mxu0 %v977_v27 }
  0x68   :  { %938 = vmatprep.mubr.bf16.mxu0 %v978_v28  ;;  %855 = vmatpush3.bf16.msra.mxu0 %v989_v20 }
  0x69   :  { %856 = vmatprep.subr.bf16.mxu0 %v990_v21 }
  0x6c   :  { %857 = vmatpush3.bf16.msra.mxu0 %v991_v23 }
  0x6d   :  { %858 = vmatprep.subr.bf16.mxu0 %v992_v25 }
  0x6f   :  { %939 = vmatmul.mubr.bf16.gmra.mrb[12].mxu0 %v979_v29 }
  0x70   :  { %859 = vmatpush3.bf16.msra.mxu0 %v993_v26  ;;  %529 = vmatprep.mubr.bf16.mxu0 %v996_v32 }
  0x71   :  { %860 = vmatprep.subr.bf16.mxu0 %v994_v30 }
  0x74   :  { %861 = vmatpush3.bf16.msra.mxu0 %v995_v31 }
 0x12a   :  { %v928_v34 = vpop.f32.mrb[0].mxu0 }
 0x12b   :  { %v243_v35 = vpop.f32.mrb[1].mxu0 }
 0x12c   :  { %v929_v36 = vpop.f32.mrb[2].mxu0 }
 0x12d   :  { %v307_v37 = vpack.c.bf16 %v929_v36, %v928_v34  ;;  %v246_v38 = vpop.f32.mrb[3].mxu0 }
 0x12e   :  { %v306_v40 = vpack.c.bf16 %v246_v38, %v243_v35 }
 0x130   :  { %530 = vmatmul.mubr.bf16.vlgmr.msra.gmra.mrb[16].mxu0 %v306_v40 }
 0x131   :  { %537 = vmatprep.mubr.bf16.mxu0 %v997_v39 }
 0x132   :  { %v932_v41 = vpop.f32.mrb[4].mxu0 }
 0x133   :  { %v259_v42 = vpop.f32.mrb[5].mxu0 }
 0x134   :  { %v933_v43 = vpop.f32.mrb[6].mxu0 }
 0x135   :  { %v309_v44 = vpack.c.bf16 %v933_v43, %v932_v41  ;;  %v262_v45 = vpop.f32.mrb[7].mxu0 }
 0x136   :  { %v308_v47 = vpack.c.bf16 %v262_v45, %v259_v42 }
 0x138   :  { %538 = vmatmul.mubr.bf16.gmra.mrb[20].mxu0 %v307_v37  ;;  %546 = vmatmul.mubr.bf16.vlgmr.msra.gmra.mrb[0].mxu1 %v308_v47 }
 0x139   :  { %553 = vmatprep.mubr.bf16.mxu1 %v999_v46 }
 0x13a   :  { %v936_v48 = vpop.f32.mrb[8].mxu0 }
 0x13b   :  { %v275_v49 = vpop.f32.mrb[9].mxu0 }
 0x13c   :  { %v937_v50 = vpop.f32.mrb[10].mxu0 }
 0x13d   :  { %v311_v51 = vpack.c.bf16 %v937_v50, %v936_v48  ;;  %v278_v52 = vpop.f32.mrb[11].mxu0 }
 0x13e   :  { %v310_v54 = vpack.c.bf16 %v278_v52, %v275_v49 }
 0x140   :  { %554 = vmatmul.mubr.bf16.gmra.mrb[4].mxu1 %v309_v44 }
 0x141   :  { %561 = vmatprep.mubr.bf16.mxu1 %v1000_v53 }
 0x142   :  { %v940_v55 = vpop.f32.mrb[12].mxu0 }
 0x143   :  { %v291_v56 = vpop.f32.mrb[13].mxu0 }
 0x144   :  { %v941_v57 = vpop.f32.mrb[14].mxu0 }
 0x145   :  { %v313_v59 = vpack.c.bf16 %v941_v57, %v940_v55  ;;  %v294_v60 = vpop.f32.mrb[15].mxu0 }
 0x146   :  { %v312_v61 = vpack.c.bf16 %v294_v60, %v291_v56 }
 0x148   :  { %562 = vmatmul.mubr.bf16.gmra.mrb[8].mxu1 %v310_v54 }
 0x149   :  { %569 = vmatprep.mubr.bf16.mxu1 %v1001_v58 }
 0x150   :  { %570 = vmatmul.mubr.bf16.gmra.mrb[12].mxu1 %v311_v51 }
 0x151   :  { %577 = vmatprep.mubr.bf16.mxu1 %v1002_v62 }
 0x158   :  { %578 = vmatmul.mubr.bf16.gmra.mrb[16].mxu1 %v312_v61 }
 0x159   :  { %585 = vmatprep.mubr.bf16.mxu1 %v1003_v63 }
 0x160   :  { %586 = vmatmul.mubr.bf16.gmra.mrb[20].mxu1 %v313_v59 }
 0x203   :  { %v862_v0 = vpop.f32.mrb[16].mxu0 }
 0x204   :  { %v863_v2 = vpop.f32.mrb[17].mxu0 }
 0x205   :  { %v864_v3 = vadd.f32 %v863_v2, %v862_v0  ;;  %v865_v4 = vpop.f32.mrb[18].mxu0 }
 0x206   :  { %v866_v5 = vpop.f32.mrb[19].mxu0 }
 0x207   :  { %v532_v6 = vadd.f32 %v864_v3, %v1184_v1  ;;  %v867_v7 = vadd.f32 %v866_v5, %v865_v4 }
 0x209   :  { %v535_v8 = vadd.f32 %v867_v7, %v1184_v1  ;;  %v594_v9 = vmax.f32 %v532_v6, 0.0 }
 0x20b   :  { %v595_v10 = vmax.f32 %v535_v8, 0.0  ;;  %v868_v11 = vpop.f32.mrb[20].mxu0  ;;  %v874_v12 = vpop.f32.mrb[0].mxu1 }
 0x20c   :  { %v869_v13 = vpop.f32.mrb[21].mxu0  ;;  %v875_v14 = vpop.f32.mrb[1].mxu1 }
 0x20d   :  { %v786_v15 = vpack.c.bf16 %v595_v10, %v594_v9  ;;  %v870_v16 = vadd.f32 %v869_v13, %v868_v11  ;;  %v876_v17 = vadd.f32 %v875_v14, %v874_v12  ;;  %v871_v18 = vpop.f32.mrb[22].mxu0  ;;  %v877_v19 = vpop.f32.mrb[2].mxu1 }
 0x20e   :  { %v872_v20 = vpop.f32.mrb[23].mxu0  ;;  %v878_v21 = vpop.f32.mrb[3].mxu1 }
 0x20f   :  { %787 = vst [vmem:[#allocation8] sm:$0xff] %v786_v15   ;;  %v540_v22 = vadd.f32 %v870_v16, %v1184_v1  ;;  %v548_v23 = vadd.f32 %v876_v17, %v1184_v1  ;;  %v873_v24 = vadd.f32 %v872_v20, %v871_v18  ;;  %v879_v25 = vadd.f32 %v878_v21, %v877_v19 }
 0x211   :  { %v543_v26 = vadd.f32 %v873_v24, %v1184_v1  ;;  %v551_v27 = vadd.f32 %v879_v25, %v1184_v1  ;;  %v596_v28 = vmax.f32 %v540_v22, 0.0  ;;  %v598_v29 = vmax.f32 %v548_v23, 0.0 }
 0x213   :  { %v597_v30 = vmax.f32 %v543_v26, 0.0  ;;  %v599_v31 = vmax.f32 %v551_v27, 0.0  ;;  %v880_v32 = vpop.f32.mrb[4].mxu1 }
 0x214   :  { %v881_v33 = vpop.f32.mrb[5].mxu1 }
 0x215   :  { %v791_v34 = vpack.c.bf16 %v597_v30, %v596_v28  ;;  %v796_v35 = vpack.c.bf16 %v599_v31, %v598_v29  ;;  %v882_v36 = vadd.f32 %v881_v33, %v880_v32  ;;  %v883_v37 = vpop.f32.mrb[6].mxu1 }
 0x216   :  { %v884_v38 = vpop.f32.mrb[7].mxu1 }
 0x217   :  { %823 = vst [vmem:[#allocation8 + $0x8] sm:$0xff] %v791_v34   ;;  %824 = vst [vmem:[#allocation8 + $0x10] sm:$0xff] %v796_v35   ;;  %v556_v39 = vadd.f32 %v882_v36, %v1184_v1  ;;  %v885_v40 = vadd.f32 %v884_v38, %v883_v37 }
 0x219   :  { %v559_v41 = vadd.f32 %v885_v40, %v1184_v1  ;;  %v600_v42 = vmax.f32 %v556_v39, 0.0 }
 0x21b   :  { %v601_v43 = vmax.f32 %v559_v41, 0.0  ;;  %v886_v44 = vpop.f32.mrb[8].mxu1 }
 0x21c   :  { %v887_v45 = vpop.f32.mrb[9].mxu1 }
 0x21d   :  { %v801_v46 = vpack.c.bf16 %v601_v43, %v600_v42  ;;  %v888_v47 = vadd.f32 %v887_v45, %v886_v44  ;;  %v889_v48 = vpop.f32.mrb[10].mxu1 }
 0x21e   :  { %v890_v49 = vpop.f32.mrb[11].mxu1 }
 0x21f   :  { %825 = vst [vmem:[#allocation8 + $0x18] sm:$0xff] %v801_v46   ;;  %v564_v50 = vadd.f32 %v888_v47, %v1184_v1  ;;  %v891_v51 = vadd.f32 %v890_v49, %v889_v48 }
 0x221   :  { %v567_v52 = vadd.f32 %v891_v51, %v1184_v1  ;;  %v602_v53 = vmax.f32 %v564_v50, 0.0 }
 0x223   :  { %v603_v54 = vmax.f32 %v567_v52, 0.0  ;;  %v892_v55 = vpop.f32.mrb[12].mxu1 }
 0x224   :  { %v893_v56 = vpop.f32.mrb[13].mxu1 }
 0x225   :  { %v806_v57 = vpack.c.bf16 %v603_v54, %v602_v53  ;;  %v894_v58 = vadd.f32 %v893_v56, %v892_v55  ;;  %v895_v59 = vpop.f32.mrb[14].mxu1 }
 0x226   :  { %v896_v60 = vpop.f32.mrb[15].mxu1 }
 0x227   :  { %826 = vst [vmem:[#allocation8 + $0x20] sm:$0xff] %v806_v57   ;;  %v572_v61 = vadd.f32 %v894_v58, %v1184_v1  ;;  %v897_v62 = vadd.f32 %v896_v60, %v895_v59 }
 0x229   :  { %v575_v63 = vadd.f32 %v897_v62, %v1184_v1  ;;  %v604_v0 = vmax.f32 %v572_v61, 0.0 }
 0x22b   :  { %v605_v2 = vmax.f32 %v575_v63, 0.0  ;;  %v898_v3 = vpop.f32.mrb[16].mxu1 }
 0x22c   :  { %v899_v4 = vpop.f32.mrb[17].mxu1 }
 0x22d   :  { %v811_v5 = vpack.c.bf16 %v605_v2, %v604_v0  ;;  %v900_v6 = vadd.f32 %v899_v4, %v898_v3  ;;  %v901_v7 = vpop.f32.mrb[18].mxu1 }
 0x22e   :  { %v902_v8 = vpop.f32.mrb[19].mxu1 }
 0x22f   :  { %827 = vst [vmem:[#allocation8 + $0x28] sm:$0xff] %v811_v5   ;;  %v580_v9 = vadd.f32 %v900_v6, %v1184_v1  ;;  %v903_v10 = vadd.f32 %v902_v8, %v901_v7 }
 0x231   :  { %v583_v11 = vadd.f32 %v903_v10, %v1184_v1  ;;  %v606_v12 = vmax.f32 %v580_v9, 0.0 }
 0x233   :  { %v607_v13 = vmax.f32 %v583_v11, 0.0  ;;  %v904_v14 = vpop.f32.mrb[20].mxu1 }
 0x234   :  { %v905_v15 = vpop.f32.mrb[21].mxu1 }
 0x235   :  { %v816_v16 = vpack.c.bf16 %v607_v13, %v606_v12  ;;  %v906_v17 = vadd.f32 %v905_v15, %v904_v14  ;;  %v907_v18 = vpop.f32.mrb[22].mxu1 }
 0x236   :  { %v908_v19 = vpop.f32.mrb[23].mxu1 }
 0x237   :  { %828 = vst [vmem:[#allocation8 + $0x30] sm:$0xff] %v816_v16   ;;  %v588_v20 = vadd.f32 %v906_v17, %v1184_v1  ;;  %v909_v21 = vadd.f32 %v908_v19, %v907_v18 }
 0x239   :  { %v591_v22 = vadd.f32 %v909_v21, %v1184_v1  ;;  %v608_v23 = vmax.f32 %v588_v20, 0.0 }
 0x23b   :  { %v609_v24 = vmax.f32 %v591_v22, 0.0 }
 0x23d   :  { %v821_v25 = vpack.c.bf16 %v609_v24, %v608_v23 }
 0x23f   :  { %829 = vst [vmem:[#allocation8 + $0x38] sm:$0xff] %v821_v25  }
 0x240   :  { %1081 = shalt.err (!%p1078_p0)
}
 0x241   :  { %s1082_s6 = scalar_lea.hbm %s1221_s4, 1024 }
 0x242   :  { %p1083_p1 = scmp.ne.s32.totalorder %s1221_s4, %s1082_s6  ;;  %p1086_p2 = scmp.lt.u32.totalorder %s1082_s6, %s1221_s4 }
 0x244   :  { %p1088_p3 = pnand %p1086_p2, %p1083_p1 }
 0x246   :  { %1091 = shalt.err (!%p1088_p3)
}
 0x247   :  { %701 = dma.vmem_to_hbm [thread:$0]  %s696_s26, 1024, %s1221_s4, [#allocation4], %s1100_s27, %s1100_s27, %s1101_s28  }
 0x248   :  { %1096 = dma.done.wait [#allocation4], 1024  }
 0x249   :  { %1097 = vsyncadd [#allocation4], 4294966272 }
 0x24a   :  { %705 = vsyncpa [#allocation3], 1 }
 0x24b   :  { %706 = vsyncpa [#allocation6], 1 }
 0x24c   :  { %707 = vsyncpa [#allocation4], 1 }

</bundles_post_ra>
